<compile_context>
chip_gen: v6e
topology: v6e:2x2x1
jax: 0.10.0
libtpu: 0.0.40
codegen_flags: <defaults>
</compile_context>

<pallas_src>
import functools

import jax
import jax.numpy as jnp
from jax.experimental import pallas as pl
from jax.experimental.pallas import tpu as pltpu

# Logical / padded widths (small, lane-aligned stand-ins for B7 widths).
C_IN = 3
C_STEM = 32            # logical stem width
C_STEM_PAD = 128       # padded to lane width (128)
N_FEATURES = 128       # head width (already lane-aligned)
K_STEM = 3 * 3 * C_IN  # 27
K_STEM_PAD = 32        # padded to a sublane-friendly size
OUT_PAD = 128          # FC output padded to a lane-dense slab


# ----------------------------------------------------------------------------
# Fused Pallas kernel: stem conv + BN + swish -> head 1x1 conv + BN + swish ->
# global-average-pool partial sums -> (on last HW tile) Linear(n_features, 1).
# ----------------------------------------------------------------------------
def _fused_kernel(p_ref, stem_w_ref, stem_s_ref, stem_b_ref,
                  head_w_ref, head_s_ref, head_b_ref,
                  fc_w_ref, fc_b_ref,
                  o_ref, acc_ref, *, hw_total):
    h_idx = pl.program_id(1)
    n_hw = pl.num_programs(1)

    @pl.when(h_idx == 0)
    def _():
        acc_ref[...] = jnp.zeros_like(acc_ref)

    patches = p_ref[0]                                     # (T_HW, K_pad) bf16

    # stem conv (as matmul) + folded BN + swish  (bf16 MXU, f32 accumulate)
    y = jnp.dot(patches, stem_w_ref[...],
                preferred_element_type=jnp.float32)        # (T_HW, C_pad) f32
    y = y * stem_s_ref[...] + stem_b_ref[...]
    y = y * jax.nn.sigmoid(y)                              # swish (EUP)

    # head 1x1 conv + folded BN + swish
    z = jnp.dot(y.astype(jnp.bfloat16), head_w_ref[...],
                preferred_element_type=jnp.float32)        # (T_HW, F) f32
    z = z * head_s_ref[...] + head_b_ref[...]
    z = z * jax.nn.sigmoid(z)

    # global-average-pool partial sums (per image)
    acc_ref[...] += jnp.sum(z, axis=0, keepdims=True)      # (1, F)

    @pl.when(h_idx == n_hw - 1)
    def _():
        pooled = acc_ref[...] * (1.0 / float(hw_total))    # (1, F)
        res = jnp.dot(pooled, fc_w_ref[...],
                      preferred_element_type=jnp.float32) + fc_b_ref[...]
        # lane-dense (1, 8, 128) store; only [0, 0, 0] is meaningful.
        o_ref[...] = jnp.broadcast_to(res, o_ref.shape)


def _choose_hw_tile(hw, cap=512):
    # Largest multiple-of-8 tile <= cap that evenly divides HW (so no padded
    # rows pollute the pooling sum).  cap=512 keeps the double-buffered tiles
    # far below the v7x 32 MiB scoped-VMEM default even at B7 widths.
    for t in (512, 256, 128, 64, 32, 16, 8):
        if t <= cap and t <= hw and hw % t == 0:
            return t
    return hw


def fused_forward(patches3, params):
    """patches3: [N, HW, K_pad] bf16 im2col patches -> [N, 1] f32 logits."""
    n, hw, k_pad = patches3.shape
    c_pad = params["stem_w"].shape[1]
    f = params["head_w"].shape[1]
    out_pad = params["fc_w"].shape[1]

    t_hw = _choose_hw_tile(hw)
    grid = (n, hw // t_hw)

    m = n * hw
    cost = pl.CostEstimate(
        flops=int(2 * m * (k_pad * c_pad + c_pad * f) + 2 * n * f * out_pad),
        transcendentals=int(m * (c_pad + f)),
        bytes_accessed=int(
            patches3.size * patches3.dtype.itemsize
            + sum(int(v.size) * v.dtype.itemsize for v in params.values())
            + n * 8 * out_pad * 4),
    )

    out = pl.pallas_call(
        functools.partial(_fused_kernel, hw_total=hw),
        out_shape=jax.ShapeDtypeStruct((n, 8, out_pad), jnp.float32),
        grid_spec=pltpu.PrefetchScalarGridSpec(
            num_scalar_prefetch=0,
            grid=grid,
            in_specs=[
                pl.BlockSpec((1, t_hw, k_pad), lambda b, h: (b, h, 0)),
                pl.BlockSpec((k_pad, c_pad), lambda b, h: (0, 0)),
                pl.BlockSpec((1, c_pad), lambda b, h: (0, 0)),
                pl.BlockSpec((1, c_pad), lambda b, h: (0, 0)),
                pl.BlockSpec((c_pad, f), lambda b, h: (0, 0)),
                pl.BlockSpec((1, f), lambda b, h: (0, 0)),
                pl.BlockSpec((1, f), lambda b, h: (0, 0)),
                pl.BlockSpec((f, out_pad), lambda b, h: (0, 0)),
                pl.BlockSpec((1, out_pad), lambda b, h: (0, 0)),
            ],
            out_specs=pl.BlockSpec((1, 8, out_pad), lambda b, h: (b, 0, 0)),
            scratch_shapes=[pltpu.VMEM((1, f), jnp.float32)],
        ),
        compiler_params=pltpu.CompilerParams(
            dimension_semantics=("parallel", "arbitrary")),
        cost_estimate=cost,
    )(patches3,
      params["stem_w"], params["stem_scale"], params["stem_bias"],
      params["head_w"], params["head_scale"], params["head_bias"],
      params["fc_w"], params["fc_b"])

    return out[:, 0, :1]                                    # (N, 1)


# ----------------------------------------------------------------------------
# Plain-JAX glue
# ----------------------------------------------------------------------------
def im2col(x_nhwc, kh, kw, stride, pad):
    """x: [N, H, W, C] -> patches [N*Ho*Wo, kh*kw*C]."""
    x = jnp.pad(x_nhwc, ((0, 0), (pad, pad), (pad, pad), (0, 0)))
    N, H, W, C = x.shape
    Ho = (H - kh) // stride + 1
    Wo = (W - kw) // stride + 1
    cols = []
    for i in range(kh):
        for j in range(kw):
            cols.append(
                x[:, i : i + Ho * stride : stride, j : j + Wo * stride : stride, :]
            )
    p = jnp.stack(cols, axis=-2)  # [N, Ho, Wo, kh*kw, C]
    return p.reshape(N * Ho * Wo, kh * kw * C), (N, Ho, Wo)


def fold_bn(gamma, beta, mean, var, eps=1e-3):
    scale = gamma / jnp.sqrt(var + eps)
    bias = beta - mean * scale
    return scale[None, :], bias[None, :]


def init_params(key):
    ks = jax.random.split(key, 10)
    f32 = jnp.float32
    p = {}

    # stem 3x3 conv (no bias, BN folded), padded K 27->32, Cout 32->128, bf16.
    stem_w = 0.1 * jax.random.normal(ks[0], (K_STEM, C_STEM), f32)
    p["stem_w"] = (jnp.zeros((K_STEM_PAD, C_STEM_PAD), f32)
                   .at[:K_STEM, :C_STEM].set(stem_w)).astype(jnp.bfloat16)
    s_scale, s_bias = fold_bn(
        1.0 + 0.05 * jax.random.normal(ks[1], (C_STEM,), f32),
        0.05 * jax.random.normal(ks[2], (C_STEM,), f32),
        0.05 * jax.random.normal(ks[3], (C_STEM,), f32),
        1.0 + 0.05 * jax.random.uniform(ks[4], (C_STEM,), f32),
    )
    p["stem_scale"] = jnp.ones((1, C_STEM_PAD), f32).at[:, :C_STEM].set(s_scale)
    p["stem_bias"] = jnp.zeros((1, C_STEM_PAD), f32).at[:, :C_STEM].set(s_bias)

    # head 1x1 conv to n_features (no bias, BN folded), padded rows, bf16.
    head_w = 0.1 * jax.random.normal(ks[5], (C_STEM, N_FEATURES), f32)
    p["head_w"] = (jnp.zeros((C_STEM_PAD, N_FEATURES), f32)
                   .at[:C_STEM, :].set(head_w)).astype(jnp.bfloat16)
    p["head_scale"], p["head_bias"] = fold_bn(
        1.0 + 0.05 * jax.random.normal(ks[6], (N_FEATURES,), f32),
        0.05 * jax.random.normal(ks[7], (N_FEATURES,), f32),
        0.05 * jax.random.normal(ks[8], (N_FEATURES,), f32),
        1.0 + 0.05 * jax.random.uniform(ks[9], (N_FEATURES,), f32),
    )

    # replaced final fc: Linear(n_features, 1, bias=True), lane-padded to 128.
    fc_w = 0.1 * jax.random.normal(jax.random.PRNGKey(42), (N_FEATURES, 1), f32)
    p["fc_w"] = jnp.zeros((N_FEATURES, OUT_PAD), f32).at[:, :1].set(fc_w)
    p["fc_b"] = jnp.zeros((1, OUT_PAD), f32).at[0, 0].set(0.01)
    return p


def model_forward(x_nchw, params):
    # NCHW (PyTorch) -> NHWC
    x = jnp.transpose(x_nchw, (0, 2, 3, 1)).astype(jnp.float32)
    # stem patches: 3x3 conv, stride 2, pad 1 (im2col in the wrapper; K padded
    # 27 -> 32, cast to bf16 for the MXU / halved HBM traffic).
    patches, (n, ho, wo) = im2col(x, 3, 3, 2, 1)            # [N*Ho*Wo, 27]
    patches = jnp.pad(patches, ((0, 0), (0, K_STEM_PAD - patches.shape[1])))
    patches3 = patches.astype(jnp.bfloat16).reshape(n, ho * wo, K_STEM_PAD)
    # fused stem conv + head conv + BN/swish + global-avg-pool + FC kernel.
    return fused_forward(patches3, params)                  # [N, 1]


if __name__ == "__main__":
    key = jax.random.PRNGKey(0)
    k_x, k_p = jax.random.split(key)
    x = jax.random.normal(k_x, (2, 3, 16, 16), jnp.float32)  # NCHW RGB images
    params = init_params(k_p)
    out = jax.jit(model_forward)(x, params)
    jax.block_until_ready(out)
    assert out.shape == (2, 1), out.shape
    print("KERNEL_OK")
</pallas_src>

<mosaic_0001>
module attributes {stable_mosaic.version = 11 : i64} {
  func.func @_fused_kernel(%arg0: i32, %arg1: i32, %arg2: memref<1x64x32xbf16, #tpu.memory_space<vmem>>, %arg3: memref<32x128xbf16, #tpu.memory_space<vmem>>, %arg4: memref<1x128xf32, #tpu.memory_space<vmem>>, %arg5: memref<1x128xf32, #tpu.memory_space<vmem>>, %arg6: memref<128x128xbf16, #tpu.memory_space<vmem>>, %arg7: memref<1x128xf32, #tpu.memory_space<vmem>>, %arg8: memref<1x128xf32, #tpu.memory_space<vmem>>, %arg9: memref<128x128xf32, #tpu.memory_space<vmem>>, %arg10: memref<1x128xf32, #tpu.memory_space<vmem>>, %arg11: memref<1x8x128xf32, #tpu.memory_space<vmem>>, %arg12: memref<1x128xf32, #tpu.memory_space<vmem>>) attributes {dimension_semantics = [#tpu.dimension_semantics<parallel>, #tpu.dimension_semantics<arbitrary>], iteration_bounds = array<i64: 2, 1>, scalar_prefetch = 0 : i64, scratch_operands = 1 : i64, tpu.core_type = #tpu.core_type<tc>, window_params = [{transform_indices = @transform_0, window_bounds = array<i64: 1, 64, 32>}, {pipeline_mode = #tpu.pipeline_mode<synchronous>, transform_indices = @transform_1, window_bounds = array<i64: 32, 128>}, {pipeline_mode = #tpu.pipeline_mode<synchronous>, transform_indices = @transform_2, window_bounds = array<i64: 1, 128>}, {pipeline_mode = #tpu.pipeline_mode<synchronous>, transform_indices = @transform_3, window_bounds = array<i64: 1, 128>}, {pipeline_mode = #tpu.pipeline_mode<synchronous>, transform_indices = @transform_4, window_bounds = array<i64: 128, 128>}, {pipeline_mode = #tpu.pipeline_mode<synchronous>, transform_indices = @transform_5, window_bounds = array<i64: 1, 128>}, {pipeline_mode = #tpu.pipeline_mode<synchronous>, transform_indices = @transform_6, window_bounds = array<i64: 1, 128>}, {pipeline_mode = #tpu.pipeline_mode<synchronous>, transform_indices = @transform_7, window_bounds = array<i64: 128, 128>}, {pipeline_mode = #tpu.pipeline_mode<synchronous>, transform_indices = @transform_8, window_bounds = array<i64: 1, 128>}, {transform_indices = @transform_9, window_bounds = array<i64: 1, 8, 128>}]} {
    %c0_i32 = arith.constant 0 : i32
    %0 = arith.cmpi eq, %arg1, %c0_i32 : i32
    %1 = arith.extui %0 : i1 to i32
    %c0_i32_0 = arith.constant 0 : i32
    %2 = arith.cmpi ne, %1, %c0_i32_0 : i32
    scf.if %2 {
      %cst_25 = arith.constant 0.000000e+00 : f32
      %42 = vector.broadcast %cst_25 : f32 to vector<1x128xf32>
      %c0_26 = arith.constant 0 : index
      %c0_27 = arith.constant 0 : index
      %43 = vector.load %arg12[%c0_26, %c0_27] : memref<1x128xf32, #tpu.memory_space<vmem>>, vector<1x128xf32>
      tpu.vector_store %arg12[%c0_26, %c0_27], %42 {strides = array<i32>} : memref<1x128xf32, #tpu.memory_space<vmem>>, vector<1x128xf32>,
    } else {
    }
    %c0 = arith.constant 0 : index
    %c0_1 = arith.constant 0 : index
    %c0_2 = arith.constant 0 : index
    %3 = vector.load %arg2[%c0, %c0_1, %c0_2] : memref<1x64x32xbf16, #tpu.memory_space<vmem>>, vector<1x64x32xbf16>
    %4 = vector.shape_cast %3 : vector<1x64x32xbf16> to vector<64x32xbf16>
    %c0_3 = arith.constant 0 : index
    %c0_4 = arith.constant 0 : index
    %5 = vector.load %arg3[%c0_3, %c0_4] : memref<32x128xbf16, #tpu.memory_space<vmem>>, vector<32x128xbf16>
    %cst = arith.constant dense<0.000000e+00> : vector<64x128xf32>
    %6 = tpu.matmul %4, %5, %cst {dimension_numbers = #tpu.dot_dimension_numbers<[1], [0], [0], [1], [0, 0, 1, 1], [], []>} : vector<64x32xbf16>, vector<32x128xbf16>, vector<64x128xf32> -> vector<64x128xf32>
    %c0_5 = arith.constant 0 : index
    %c0_6 = arith.constant 0 : index
    %7 = vector.load %arg4[%c0_5, %c0_6] : memref<1x128xf32, #tpu.memory_space<vmem>>, vector<1x128xf32>
    %8 = vector.broadcast %7 : vector<1x128xf32> to vector<64x128xf32>
    %9 = arith.mulf %6, %8 : vector<64x128xf32>
    %c0_7 = arith.constant 0 : index
    %c0_8 = arith.constant 0 : index
    %10 = vector.load %arg5[%c0_7, %c0_8] : memref<1x128xf32, #tpu.memory_space<vmem>>, vector<1x128xf32>
    %11 = vector.broadcast %10 : vector<1x128xf32> to vector<64x128xf32>
    %12 = arith.addf %9, %11 : vector<64x128xf32>
    %13 = arith.negf %12 : vector<64x128xf32>
    %14 = math.exp %13 : vector<64x128xf32>
    %cst_9 = arith.constant 1.000000e+00 : f32
    %15 = vector.broadcast %cst_9 : f32 to vector<64x128xf32>
    %16 = arith.addf %15, %14 : vector<64x128xf32>
    %17 = arith.divf %15, %16 : vector<64x128xf32>
    %18 = arith.mulf %12, %17 : vector<64x128xf32>
    %19 = arith.truncf %18 : vector<64x128xf32> to vector<64x128xbf16>
    %c0_10 = arith.constant 0 : index
    %c0_11 = arith.constant 0 : index
    %20 = vector.load %arg6[%c0_10, %c0_11] : memref<128x128xbf16, #tpu.memory_space<vmem>>, vector<128x128xbf16>
    %cst_12 = arith.constant dense<0.000000e+00> : vector<64x128xf32>
    %21 = tpu.matmul %19, %20, %cst_12 {dimension_numbers = #tpu.dot_dimension_numbers<[1], [0], [0], [1], [0, 0, 1, 1], [], []>} : vector<64x128xbf16>, vector<128x128xbf16>, vector<64x128xf32> -> vector<64x128xf32>
    %c0_13 = arith.constant 0 : index
    %c0_14 = arith.constant 0 : index
    %22 = vector.load %arg7[%c0_13, %c0_14] : memref<1x128xf32, #tpu.memory_space<vmem>>, vector<1x128xf32>
    %23 = vector.broadcast %22 : vector<1x128xf32> to vector<64x128xf32>
    %24 = arith.mulf %21, %23 : vector<64x128xf32>
    %c0_15 = arith.constant 0 : index
    %c0_16 = arith.constant 0 : index
    %25 = vector.load %arg8[%c0_15, %c0_16] : memref<1x128xf32, #tpu.memory_space<vmem>>, vector<1x128xf32>
    %26 = vector.broadcast %25 : vector<1x128xf32> to vector<64x128xf32>
    %27 = arith.addf %24, %26 : vector<64x128xf32>
    %28 = arith.negf %27 : vector<64x128xf32>
    %29 = math.exp %28 : vector<64x128xf32>
    %cst_17 = arith.constant 1.000000e+00 : f32
    %30 = vector.broadcast %cst_17 : f32 to vector<64x128xf32>
    %31 = arith.addf %30, %29 : vector<64x128xf32>
    %32 = arith.divf %30, %31 : vector<64x128xf32>
    %33 = arith.mulf %27, %32 : vector<64x128xf32>
    %c0_18 = arith.constant 0 : index
    %c0_19 = arith.constant 0 : index
    %34 = vector.load %arg12[%c0_18, %c0_19] : memref<1x128xf32, #tpu.memory_space<vmem>>, vector<1x128xf32>
    %cst_20 = arith.constant dense<0.000000e+00> : vector<128xf32>
    %35 = vector.multi_reduction <add>, %33, %cst_20 [0] : vector<64x128xf32> to vector<128xf32>
    %36 = vector.shape_cast %35 : vector<128xf32> to vector<1x128xf32>
    %37 = arith.addf %34, %36 : vector<1x128xf32>
    %c0_21 = arith.constant 0 : index
    %c0_22 = arith.constant 0 : index
    %38 = vector.load %arg12[%c0_21, %c0_22] : memref<1x128xf32, #tpu.memory_space<vmem>>, vector<1x128xf32>
    tpu.vector_store %arg12[%c0_21, %c0_22], %37 {strides = array<i32>} : memref<1x128xf32, #tpu.memory_space<vmem>>, vector<1x128xf32>,
    %c0_i32_23 = arith.constant 0 : i32
    %39 = arith.cmpi eq, %arg1, %c0_i32_23 : i32
    %40 = arith.extui %39 : i1 to i32
    %c0_i32_24 = arith.constant 0 : i32
    %41 = arith.cmpi ne, %40, %c0_i32_24 : i32
    scf.if %41 {
      %c0_25 = arith.constant 0 : index
      %c0_26 = arith.constant 0 : index
      %42 = vector.load %arg12[%c0_25, %c0_26] : memref<1x128xf32, #tpu.memory_space<vmem>>, vector<1x128xf32>
      %cst_27 = arith.constant 1.562500e-02 : f32
      %43 = vector.broadcast %cst_27 : f32 to vector<1x128xf32>
      %44 = arith.mulf %42, %43 : vector<1x128xf32>
      %c0_28 = arith.constant 0 : index
      %c0_29 = arith.constant 0 : index
      %45 = vector.load %arg9[%c0_28, %c0_29] : memref<128x128xf32, #tpu.memory_space<vmem>>, vector<128x128xf32>
      %cst_30 = arith.constant dense<0.000000e+00> : vector<1x128xf32>
      %46 = tpu.matmul %44, %45, %cst_30 {dimension_numbers = #tpu.dot_dimension_numbers<[1], [0], [0], [1], [0, 0, 1, 1], [], []>} : vector<1x128xf32>, vector<128x128xf32>, vector<1x128xf32> -> vector<1x128xf32>
      %c0_31 = arith.constant 0 : index
      %c0_32 = arith.constant 0 : index
      %47 = vector.load %arg10[%c0_31, %c0_32] : memref<1x128xf32, #tpu.memory_space<vmem>>, vector<1x128xf32>
      %48 = arith.addf %46, %47 : vector<1x128xf32>
      %49 = vector.shape_cast %48 : vector<1x128xf32> to vector<1x1x128xf32>
      %50 = vector.broadcast %49 : vector<1x1x128xf32> to vector<1x8x128xf32>
      %c0_33 = arith.constant 0 : index
      %c0_34 = arith.constant 0 : index
      %c0_35 = arith.constant 0 : index
      %51 = vector.load %arg11[%c0_33, %c0_34, %c0_35] : memref<1x8x128xf32, #tpu.memory_space<vmem>>, vector<1x8x128xf32>
      tpu.vector_store %arg11[%c0_33, %c0_34, %c0_35], %50 {strides = array<i32>} : memref<1x8x128xf32, #tpu.memory_space<vmem>>, vector<1x8x128xf32>,
    } else {
    }
    return
  }
  func.func @transform_0(%arg0: i32, %arg1: i32) -> (i32, i32, i32) {
    %c0_i32 = arith.constant 0 : i32
    %c0_i32_0 = arith.constant 0 : i32
    return %arg0, %arg1, %c0_i32 : i32, i32, i32
  }
  func.func @transform_1(%arg0: i32, %arg1: i32) -> (i32, i32) {
    %c0_i32 = arith.constant 0 : i32
    %c0_i32_0 = arith.constant 0 : i32
    %c0_i32_1 = arith.constant 0 : i32
    return %c0_i32, %c0_i32_0 : i32, i32
  }
  func.func @transform_2(%arg0: i32, %arg1: i32) -> (i32, i32) {
    %c0_i32 = arith.constant 0 : i32
    %c0_i32_0 = arith.constant 0 : i32
    %c0_i32_1 = arith.constant 0 : i32
    return %c0_i32, %c0_i32_0 : i32, i32
  }
  func.func @transform_3(%arg0: i32, %arg1: i32) -> (i32, i32) {
    %c0_i32 = arith.constant 0 : i32
    %c0_i32_0 = arith.constant 0 : i32
    %c0_i32_1 = arith.constant 0 : i32
    return %c0_i32, %c0_i32_0 : i32, i32
  }
  func.func @transform_4(%arg0: i32, %arg1: i32) -> (i32, i32) {
    %c0_i32 = arith.constant 0 : i32
    %c0_i32_0 = arith.constant 0 : i32
    %c0_i32_1 = arith.constant 0 : i32
    return %c0_i32, %c0_i32_0 : i32, i32
  }
  func.func @transform_5(%arg0: i32, %arg1: i32) -> (i32, i32) {
    %c0_i32 = arith.constant 0 : i32
    %c0_i32_0 = arith.constant 0 : i32
    %c0_i32_1 = arith.constant 0 : i32
    return %c0_i32, %c0_i32_0 : i32, i32
  }
  func.func @transform_6(%arg0: i32, %arg1: i32) -> (i32, i32) {
    %c0_i32 = arith.constant 0 : i32
    %c0_i32_0 = arith.constant 0 : i32
    %c0_i32_1 = arith.constant 0 : i32
    return %c0_i32, %c0_i32_0 : i32, i32
  }
  func.func @transform_7(%arg0: i32, %arg1: i32) -> (i32, i32) {
    %c0_i32 = arith.constant 0 : i32
    %c0_i32_0 = arith.constant 0 : i32
    %c0_i32_1 = arith.constant 0 : i32
    return %c0_i32, %c0_i32_0 : i32, i32
  }
  func.func @transform_8(%arg0: i32, %arg1: i32) -> (i32, i32) {
    %c0_i32 = arith.constant 0 : i32
    %c0_i32_0 = arith.constant 0 : i32
    %c0_i32_1 = arith.constant 0 : i32
    return %c0_i32, %c0_i32_0 : i32, i32
  }
  func.func @transform_9(%arg0: i32, %arg1: i32) -> (i32, i32, i32) {
    %c0_i32 = arith.constant 0 : i32
    %c0_i32_0 = arith.constant 0 : i32
    %c0_i32_1 = arith.constant 0 : i32
    return %arg0, %c0_i32, %c0_i32_0 : i32, i32, i32
  }
}

</mosaic_0001>

<bundles_post_ra>
// kernel: model_forward.1
= control target key start
LH: loop header
LB: loop body
LE: loop exit
PB: predicated region body
PF: predicated region fallthrough
CT: control target
= control target key end

     0   :  { %s1307_s30 = smov 0   ;;  %s1309_s10 = smov 0   ;;  %s1445_s0 = inlined_call_operand.vmem [shape: bf16[2,64,32], index: 0, kind: input, shape index: {}]   ;;  %s1446_s1 = inlined_call_operand.vmem [shape: bf16[32,128], index: 1, kind: input, shape index: {}]   ;;  %s1447_s2 = inlined_call_operand.vmem [shape: f32[1,128], index: 2, kind: input, shape index: {}]   ;;  %s1448_s3 = inlined_call_operand.vmem [shape: f32[1,128], index: 3, kind: input, shape index: {}]   ;;  %s1449_s4 = inlined_call_operand.vmem [shape: bf16[128,128], index: 4, kind: input, shape index: {}]   ;;  %s1450_s5 = inlined_call_operand.vmem [shape: f32[1,128], index: 5, kind: input, shape index: {}]   ;;  %s1451_s6 = inlined_call_operand.vmem [shape: f32[1,128], index: 6, kind: input, shape index: {}]   ;;  %s1452_s7 = inlined_call_operand.vmem [shape: f32[128,128], index: 7, kind: input, shape index: {}]   ;;  %s1453_s8 = inlined_call_operand.vmem [shape: f32[1,128], index: 8, kind: input, shape index: {}]   ;;  %s1454_s9 = inlined_call_operand.vmem [shape: f32[2,8,128], index: 9, kind: output, shape index: {}]  }
   0x1   :  { %s1311_s11 = smov 0  }
   0x2 LB: > { %s31_s12 = sadd.s32 1, %s1249_s10  ;;  %p976_p0 = scmp.ge.s32.totalorder %s1253_s11, 1  ;;  %s1253_s11 = sphi %s1311_s11, %s19_s11   ;;  %s1249_s10 = sphi %s1309_s10, %s1456_s10   ;;  %s1245_s30 = sphi %s1307_s30, %s1455_s30  }
   0x3   : > { %p33_p1 = scmp.ge.s32.totalorder %s31_s12, 2  ;;  %p306_p2 = scmp.lt.s32.totalorder %s1253_s11, 3 }
   0x5   : > { %s1458_s12 = smov (%p33_p1, %s31_s12), 0  ;;  %p307_p3 = pnand %p976_p0, %p306_p2 }
   0x6   : > { %p346_p4 = scmp.lt.s32.totalorder (!%p307_p3), %s1245_s30, 1 }
   0x7   : > { %310 = sbr.rel (%p307_p3) target bundleno = 734 (0x2de), region = 56 }
   0xc   : > { %v1153_v0 = vld [vmem:[%s1446_s1 + $0x8] sm:$0xff]   ;;  %v1154_v1 = vld [vmem:[%s1446_s1] sm:$0xff]   ;;  %s1460_s30 = smov (!%p346_p4, %s1245_s30), 1  ;;  %vm409_vm0 = vcmask 261120   ;;  %v1159_v6 = vld [vmem:[%s1449_s4 + $0x38] sm:$0xff]   ;;  %vm1256_vm1 = vmmov 0  }
   0xd   : > { %1056 = vmatprep.subr.bf16.mxu0 %v1153_v0  ;;  %s1020_s17 = sshll.u32 %s1460_s30, 5  ;;  %1068 = vmatprep.subr.bf16.mxu1 %v1159_v6  ;;  %v1160_v7 = vld [vmem:[%s1449_s4 + $0x30] sm:$0xff]   ;;  %v1161_v8 = vld [vmem:[%s1449_s4 + $0x28] sm:$0xff]   ;;  %v1162_v9 = vld [vmem:[%s1449_s4 + $0x20] sm:$0xff]   ;;  %s979_s28 = sshll.u32 %s1460_s30, 3 }
   0xe   : > { %1057 = vmatpush3.bf16.msra.mxu0 %v1153_v0  ;;  %s353_s20 = scalar_lea.vmem %s1445_s0, %s1020_s17  ;;  %1069 = vmatpush3.bf16.msra.mxu1 %v1159_v6  ;;  %v1163_v10 = vld [vmem:[%s1449_s4 + $0x18] sm:$0xff]   ;;  %v1164_v11 = vld [vmem:[%s1449_s4 + $0x10] sm:$0xff]   ;;  %v1165_v12 = vld [vmem:[%s1449_s4 + $0x8] sm:$0xff]   ;;  %s358_s14 = scalar_lea.vmem %s1454_s9, %s979_s28 }
   0xf   : > { %1058 = vmatprep.subr.bf16.mxu0 %v1154_v1  ;;  %v1155_v2 = vld [vmem:[%s353_s20] sm:$0xff]   ;;  %v1156_v3 = vld [vmem:[%s353_s20 + $0x8] sm:$0xff]   ;;  %v1157_v4 = vld [vmem:[%s353_s20 + $0x10] sm:$0xff]   ;;  %1070 = vmatprep.subr.bf16.mxu1 %v1160_v7 }
  0x10   : > { %1060 = vmatprep.mubr.msk.bf16.mxu0 %vm409_vm0, %v1155_v2  ;;  %v1158_v5 = vld [vmem:[%s353_s20 + $0x18] sm:$0xff]   ;;  %v1166_v13 = vld [vmem:[%s1449_s4] sm:$0xff]  }
  0x11   : > { %v990_v14 = vld [vmem:[%s1447_s2] ss:$0 sm:$0xff] }
  0x12   : > { %1059 = vmatpush3.bf16.msra.mxu0 %v1154_v1  ;;  %1071 = vmatpush3.bf16.msra.mxu1 %v1160_v7  ;;  %v991_v16 = vld [vmem:[%s1448_s3] ss:$0 sm:$0xff] }
  0x13   : > { %1072 = vmatprep.subr.bf16.mxu1 %v1161_v8 }
  0x15   : > { %1061 = vmatmul.mubr.msk.bf16.vlgmr.msra.gmra.mxu0 %vm409_vm0, %v1156_v3 }
  0x16   : > { %1064 = vmatprep.mubr.msk.bf16.mxu0 %vm409_vm0, %v1157_v4  ;;  %1073 = vmatpush3.bf16.msra.mxu1 %v1161_v8 }
  0x17   : > { %1074 = vmatprep.subr.bf16.mxu1 %v1162_v9 }
  0x1a   : > { %1075 = vmatpush3.bf16.msra.mxu1 %v1162_v9 }
  0x1b   : > { %1076 = vmatprep.subr.bf16.mxu1 %v1163_v10 }
  0x1d   : > { %1065 = vmatmul.mubr.msk.bf16.gmra.mxu0 %vm409_vm0, %v1158_v5 }
  0x1e   : > { %1077 = vmatpush3.bf16.msra.mxu1 %v1163_v10 }
  0x1f   : > { %1078 = vmatprep.subr.bf16.mxu1 %v1164_v11 }
  0x22   : > { %1079 = vmatpush3.bf16.msra.mxu1 %v1164_v11 }
  0x23   : > { %1080 = vmatprep.subr.bf16.mxu1 %v1165_v12 }
  0x26   : > { %1081 = vmatpush3.bf16.msra.mxu1 %v1165_v12 }
  0x27   : > { %1082 = vmatprep.subr.bf16.mxu1 %v1166_v13 }
  0x2a   : > { %1083 = vmatpush3.bf16.msra.mxu1 %v1166_v13 }
  0xd5   : > { %v1062_v15 = vpop.f32.mrf.mxu0 }
  0xd6   : > { %v496_v17 = vmul.f32 %v1062_v15, %v990_v14 }
  0xd7   : > { %v456_v18 = vpop.f32.mrf.mxu0 }
  0xd8   : > { %v1367_v19 = vadd.f32 %v991_v16, %v496_v17  ;;  %v494_v20 = vmul.f32 %v990_v14, %v456_v18 }
  0xd9   : > { %v1063_v21 = vpop.f32.mrf.mxu0 }
  0xda   : > { %v994_v22 = vmul.f32 -1.442695, %v1367_v19  ;;  %v509_v23 = vadd.f32 %v991_v16, %v494_v20  ;;  %v497_v24 = vmul.f32 %v1063_v21, %v990_v14  ;;  %v1255_v21 = vmov 0.0  }
  0xdb   : > { %v459_v25 = vpop.f32.mrf.mxu0  ;;  %364 = vst [vmem:[#allocation2] sm:$0x1] %v1255_v21  ;;  %1092 = vmatprep.subr.mxu0 %v1255_v21  ;;  %1124 = vmatprep.mubr.msk.f32.mxu0 %vm1256_vm1, %v1255_v21 }
  0xdc   : > { %v992_v26 = vmul.f32 -1.442695, %v509_v23  ;;  %v512_v27 = vadd.f32 %v991_v16, %v497_v24  ;;  %v495_v28 = vmul.f32 %v990_v14, %v459_v25  ;;  %1167 = vpow2.f32 %v994_v22  ;;  %v827_v22 = vld [vmem:[%s1452_s7 + $0x70] sm:$0xff]  ;;  %v825_v24 = vld [vmem:[%s1452_s7 + $0x60] sm:$0xff]  ;;  %v824_v25 = vld [vmem:[%s1452_s7 + $0x58] sm:$0xff] }
  0xdd   : > { %v1066_v29 = vpop.f32.mrf.mxu0 }
  0xde   : > { %1169 = vpow2.f32 %v992_v26  ;;  %v995_v30 = vmul.f32 -1.442695, %v512_v27  ;;  %v510_v31 = vadd.f32 %v991_v16, %v495_v28  ;;  %v500_v32 = vmul.f32 %v1066_v29, %v990_v14  ;;  %v823_v26 = vld [vmem:[%s1452_s7 + $0x50] sm:$0xff]  ;;  %v821_v28 = vld [vmem:[%s1452_s7 + $0x40] sm:$0xff]  ;;  %v820_v29 = vld [vmem:[%s1452_s7 + $0x38] sm:$0xff] }
  0xdf   : > { %v472_v33 = vpop.f32.mrf.mxu0 }
  0xe0   : > { %1171 = vpow2.f32 %v995_v30  ;;  %v993_v34 = vmul.f32 -1.442695, %v510_v31  ;;  %v515_v35 = vadd.f32 %v991_v16, %v500_v32  ;;  %v498_v36 = vmul.f32 %v990_v14, %v472_v33  ;;  %v819_v30 = vld [vmem:[%s1452_s7 + $0x30] sm:$0xff]  ;;  %v817_v32 = vld [vmem:[%s1452_s7 + $0x20] sm:$0xff]  ;;  %v816_v33 = vld [vmem:[%s1452_s7 + $0x18] sm:$0xff] }
  0xe1   : > { %v1067_v37 = vpop.f32.mrf.mxu0 }
  0xe2   : > { %1173 = vpow2.f32 %v993_v34  ;;  %v998_v38 = vmul.f32 -1.442695, %v515_v35  ;;  %v513_v39 = vadd.f32 %v991_v16, %v498_v36  ;;  %v501_v40 = vmul.f32 %v1067_v37, %v990_v14  ;;  %v815_v34 = vld [vmem:[%s1452_s7 + $0x10] sm:$0xff]  ;;  %v813_v36 = vld [vmem:[%s1452_s7] sm:$0xff] }
  0xe3   : > { %v475_v41 = vpop.f32.mrf.mxu0  ;;  %v1008_v37 = vld [vmem:[%s1450_s5] ss:$0 sm:$0xff] }
  0xe4   : > { %v996_v42 = vmul.f32 -1.442695, %v513_v39  ;;  %v516_v43 = vadd.f32 %v991_v16, %v501_v40  ;;  %v499_v44 = vmul.f32 %v990_v14, %v475_v41  ;;  %1175 = vpow2.f32 %v998_v38 }
  0xe6   : > { %1177 = vpow2.f32 %v996_v42  ;;  %v999_v45 = vmul.f32 -1.442695, %v516_v43  ;;  %v514_v46 = vadd.f32 %v991_v16, %v499_v44 }
  0xe8   : > { %1179 = vpow2.f32 %v999_v45  ;;  %v997_v47 = vmul.f32 -1.442695, %v514_v46 }
  0xe9   : > { %v1168_v48 = vpop.eup %1167 }
  0xea   : > { %1181 = vpow2.f32 %v997_v47  ;;  %v543_v52 = vadd.f32 1.0, %v1168_v48 }
  0xeb   : > { %v1170_v49 = vpop.eup %1169 }
  0xec   : > { %v541_v50 = vadd.f32 1.0, %v1170_v49 }
  0xed   : > { %v1172_v51 = vpop.eup %1171 }
  0xee   : > { %v544_v53 = vadd.f32 1.0, %v1172_v51  ;;  %1183 = vrcp.f32 %v541_v50 }
  0xef   : > { %v1174_v54 = vpop.eup %1173 }
  0xf0   : > { %1185 = vrcp.f32 %v544_v53  ;;  %v542_v55 = vadd.f32 1.0, %v1174_v54 }
  0xf1   : > { %1187 = vrcp.f32 %v543_v52  ;;  %v1176_v56 = vpop.eup %1175 }
  0xf2   : > { %1189 = vrcp.f32 %v542_v55  ;;  %v547_v60 = vadd.f32 1.0, %v1176_v56 }
  0xf3   : > { %v1178_v57 = vpop.eup %1177 }
  0xf4   : > { %v545_v58 = vadd.f32 1.0, %v1178_v57 }
  0xf5   : > { %v1180_v59 = vpop.eup %1179 }
  0xf6   : > { %v548_v61 = vadd.f32 1.0, %v1180_v59  ;;  %1191 = vrcp.f32 %v545_v58 }
  0xf7   : > { %v1182_v62 = vpop.eup %1181 }
  0xf8   : > { %1193 = vrcp.f32 %v548_v61  ;;  %v546_v63 = vadd.f32 1.0, %v1182_v62 }
  0xf9   : > { %1195 = vrcp.f32 %v547_v60 }
  0xfa   : > { %1197 = vrcp.f32 %v546_v63 }
  0xfb   : > { %v1184_v0 = vpop.eup %1183 }
  0xfc   : > { %v565_v5 = vmul.f32 %v1184_v0, %v509_v23  ;;  %v826_v23 = vld [vmem:[%s1452_s7 + $0x68] sm:$0xff] }
  0xfd   : > { %v1186_v1 = vpop.eup %1185 }
  0xfe   : > { %v1188_v2 = vpop.eup %1187  ;;  %v568_v4 = vmul.f32 %v1186_v1, %v512_v27  ;;  %v822_v27 = vld [vmem:[%s1452_s7 + $0x48] sm:$0xff] }
  0xff   : > { %v1190_v3 = vpop.eup %1189  ;;  %v567_v7 = vmul.f32 %v1188_v2, %v1367_v19  ;;  %v828_v19 = vld [vmem:[%s1452_s7 + $0x78] sm:$0xff] }
 0x100   : > { %v566_v6 = vmul.f32 %v1190_v3, %v510_v31  ;;  %1093 = vmatpush3.msra.mxu0 %v828_v19  ;;  %v818_v31 = vld [vmem:[%s1452_s7 + $0x28] sm:$0xff] }
 0x101   : > { %v574_v9 = vpack.c.bf16 %v568_v4, %v567_v7  ;;  %1094 = vmatprep.subr.mxu0 %v1255_v21 }
 0x102   : > { %v573_v8 = vpack.c.bf16 %v566_v6, %v565_v5  ;;  %1095 = vmatpush3.msra.mxu0 %v827_v22 }
 0x103   : > { %v1192_v10 = vpop.eup %1191  ;;  %1096 = vmatprep.subr.mxu0 %v1255_v21 }
 0x104   : > { %1084 = vmatprep.mubr.bf16.mxu1 %v573_v8  ;;  %v569_v15 = vmul.f32 %v1192_v10, %v513_v39  ;;  %1097 = vmatpush3.msra.mxu0 %v826_v23  ;;  %v1009_v39 = vld [vmem:[%s1451_s6] ss:$0 sm:$0xff] }
 0x105   : > { %v1194_v11 = vpop.eup %1193  ;;  %1085 = vmatmul.mubr.bf16.vlgmr.msra.gmra.mxu1 %v574_v9  ;;  %1098 = vmatprep.subr.mxu0 %v1255_v21 }
 0x106   : > { %v1196_v12 = vpop.eup %1195  ;;  %v572_v14 = vmul.f32 %v1194_v11, %v516_v43  ;;  %1099 = vmatpush3.msra.mxu0 %v825_v24 }
 0x107   : > { %v1198_v13 = vpop.eup %1197  ;;  %v571_v17 = vmul.f32 %v1196_v12, %v515_v35  ;;  %1100 = vmatprep.subr.mxu0 %v1255_v21  ;;  %v814_v35 = vld [vmem:[%s1452_s7 + $0x8] sm:$0xff] }
 0x108   : > { %v570_v16 = vmul.f32 %v1198_v13, %v514_v46  ;;  %1101 = vmatpush3.msra.mxu0 %v824_v25 }
 0x109   : > { %v576_v20 = vpack.c.bf16 %v572_v14, %v571_v17  ;;  %1102 = vmatprep.subr.mxu0 %v1255_v21 }
 0x10a   : > { %v575_v18 = vpack.c.bf16 %v570_v16, %v569_v15  ;;  %1103 = vmatpush3.msra.mxu0 %v823_v26 }
 0x10b   : > { %1104 = vmatprep.subr.mxu0 %v1255_v21 }
 0x10c   : > { %1088 = vmatprep.mubr.bf16.mxu1 %v575_v18  ;;  %1105 = vmatpush3.msra.mxu0 %v822_v27 }
 0x10d   : > { %1089 = vmatmul.mubr.bf16.gmra.mxu1 %v576_v20  ;;  %1106 = vmatprep.subr.mxu0 %v1255_v21 }
 0x10e   : > { %1107 = vmatpush3.msra.mxu0 %v821_v28 }
 0x10f   : > { %1108 = vmatprep.subr.mxu0 %v1255_v21 }
 0x110   : > { %1109 = vmatpush3.msra.mxu0 %v820_v29 }
 0x111   : > { %1110 = vmatprep.subr.mxu0 %v1255_v21 }
 0x112   : > { %1111 = vmatpush3.msra.mxu0 %v819_v30 }
 0x113   : > { %1112 = vmatprep.subr.mxu0 %v1255_v21 }
 0x114   : > { %1113 = vmatpush3.msra.mxu0 %v818_v31 }
 0x115   : > { %1114 = vmatprep.subr.mxu0 %v1255_v21 }
 0x116   : > { %1115 = vmatpush3.msra.mxu0 %v817_v32 }
 0x117   : > { %1116 = vmatprep.subr.mxu0 %v1255_v21 }
 0x118   : > { %1117 = vmatpush3.msra.mxu0 %v816_v33 }
 0x119   : > { %1118 = vmatprep.subr.mxu0 %v1255_v21 }
 0x11a   : > { %1119 = vmatpush3.msra.mxu0 %v815_v34 }
 0x11b   : > { %1120 = vmatprep.subr.mxu0 %v1255_v21 }
 0x11c   : > { %1121 = vmatpush3.msra.mxu0 %v814_v35 }
 0x11d   : > { %1122 = vmatprep.subr.mxu0 %v1255_v21 }
 0x11e   : > { %1123 = vmatpush3.msra.mxu0 %v813_v36 }
 0x1c5   : > { %v1086_v38 = vpop.f32.mrf.mxu1 }
 0x1c6   : > { %v715_v40 = vmul.f32 %v1086_v38, %v1008_v37 }
 0x1c7   : > { %v675_v41 = vpop.f32.mrf.mxu1 }
 0x1c8   : > { %v1425_v42 = vadd.f32 %v1009_v39, %v715_v40  ;;  %v713_v43 = vmul.f32 %v1008_v37, %v675_v41 }
 0x1c9   : > { %v1087_v44 = vpop.f32.mrf.mxu1 }
 0x1ca   : > { %v1012_v45 = vmul.f32 -1.442695, %v1425_v42  ;;  %v728_v46 = vadd.f32 %v1009_v39, %v713_v43  ;;  %v716_v47 = vmul.f32 %v1087_v44, %v1008_v37 }
 0x1cb   : > { %v678_v48 = vpop.f32.mrf.mxu1 }
 0x1cc   : > { %v1010_v49 = vmul.f32 -1.442695, %v728_v46  ;;  %v731_v50 = vadd.f32 %v1009_v39, %v716_v47  ;;  %v714_v51 = vmul.f32 %v1008_v37, %v678_v48  ;;  %1199 = vpow2.f32 %v1012_v45 }
 0x1cd   : > { %v1090_v52 = vpop.f32.mrf.mxu1 }
 0x1ce   : > { %1201 = vpow2.f32 %v1010_v49  ;;  %v1013_v53 = vmul.f32 -1.442695, %v731_v50  ;;  %v729_v54 = vadd.f32 %v1009_v39, %v714_v51  ;;  %v719_v55 = vmul.f32 %v1090_v52, %v1008_v37 }
 0x1cf   : > { %v691_v56 = vpop.f32.mrf.mxu1 }
 0x1d0   : > { %1203 = vpow2.f32 %v1013_v53  ;;  %v1011_v57 = vmul.f32 -1.442695, %v729_v54  ;;  %v734_v58 = vadd.f32 %v1009_v39, %v719_v55  ;;  %v717_v59 = vmul.f32 %v1008_v37, %v691_v56 }
 0x1d1   : > { %v1091_v60 = vpop.f32.mrf.mxu1  ;;  %v900_v56 = vlaneseq }
 0x1d2   : > { %1205 = vpow2.f32 %v1011_v57  ;;  %v1016_v61 = vmul.f32 -1.442695, %v734_v58  ;;  %v732_v62 = vadd.f32 %v1009_v39, %v717_v59  ;;  %v720_v63 = vmul.f32 %v1091_v60, %v1008_v37 }
 0x1d3   : > { %v694_v0 = vpop.f32.mrf.mxu1  ;;  %v901_v57 = vshrl.u32 %v900_v56, 7 }
 0x1d4   : > { %v1014_v1 = vmul.f32 -1.442695, %v732_v62  ;;  %v735_v2 = vadd.f32 %v1009_v39, %v720_v63  ;;  %v718_v3 = vmul.f32 %v1008_v37, %v694_v0  ;;  %1207 = vpow2.f32 %v1016_v61 }
 0x1d5   : > { %v902_v59 = vsub.s32 0, %v901_v57 }
 0x1d6   : > { %1209 = vpow2.f32 %v1014_v1  ;;  %v1017_v4 = vmul.f32 -1.442695, %v735_v2  ;;  %v733_v5 = vadd.f32 %v1009_v39, %v718_v3 }
 0x1d8   : > { %1211 = vpow2.f32 %v1017_v4  ;;  %v1015_v6 = vmul.f32 -1.442695, %v733_v5 }
 0x1d9   : > { %v1200_v7 = vpop.eup %1199 }
 0x1da   : > { %1213 = vpow2.f32 %v1015_v6  ;;  %v762_v11 = vadd.f32 1.0, %v1200_v7 }
 0x1db   : > { %v1202_v8 = vpop.eup %1201 }
 0x1dc   : > { %v760_v9 = vadd.f32 1.0, %v1202_v8 }
 0x1dd   : > { %v1204_v10 = vpop.eup %1203 }
 0x1de   : > { %1215 = vrcp.f32 %v760_v9  ;;  %v763_v13 = vadd.f32 1.0, %v1204_v10 }
 0x1df   : > { %v1206_v12 = vpop.eup %1205  ;;  %1217 = vrcp.f32 %v762_v11 }
 0x1e0   : > { %v761_v14 = vadd.f32 1.0, %v1206_v12 }
 0x1e1   : > { %v1208_v15 = vpop.eup %1207 }
 0x1e2   : > { %1219 = vrcp.f32 %v761_v14  ;;  %v766_v20 = vadd.f32 1.0, %v1208_v15 }
 0x1e3   : > { %v1210_v16 = vpop.eup %1209  ;;  %1221 = vrcp.f32 %v763_v13 }
 0x1e4   : > { %v764_v17 = vadd.f32 1.0, %v1210_v16 }
 0x1e5   : > { %v1212_v18 = vpop.eup %1211 }
 0x1e6   : > { %1223 = vrcp.f32 %v764_v17  ;;  %v767_v19 = vadd.f32 1.0, %v1212_v18 }
 0x1e7   : > { %v1214_v21 = vpop.eup %1213  ;;  %1225 = vrcp.f32 %v766_v20 }
 0x1e8   : > { %v765_v22 = vadd.f32 1.0, %v1214_v21 }
 0x1ea   : > { %1227 = vrcp.f32 %v765_v22 }
 0x1eb   : > { %1229 = vrcp.f32 %v767_v19  ;;  %v1216_v23 = vpop.eup %1215 }
 0x1ec   : > { %v1218_v24 = vpop.eup %1217  ;;  %v784_v26 = vmul.f32 %v1216_v23, %v728_v46 }
 0x1ed   : > { %v786_v29 = vmul.f32 %v1218_v24, %v1425_v42 }
 0x1ef   : > { %v1220_v25 = vpop.eup %1219 }
 0x1f0   : > { %v785_v27 = vmul.f32 %v1220_v25, %v729_v54  ;;  %v1222_v28 = vpop.eup %1221 }
 0x1f1   : > { %v787_v32 = vmul.f32 %v1222_v28, %v731_v50  ;;  %v792_v50 = vld [vmem:[#allocation2] sm:$0x1] }
 0x1f2   : > { %v793_v30 = vadd.f32 %v785_v27, %v784_v26 }
 0x1f3   : > { %v1224_v31 = vpop.eup %1223 }
 0x1f4   : > { %v794_v33 = vadd.f32 %v793_v30, %v786_v29  ;;  %v1226_v34 = vpop.eup %1225  ;;  %v788_v35 = vmul.f32 %v1224_v31, %v732_v62 }
 0x1f5   : > { %v790_v41 = vmul.f32 %v1226_v34, %v734_v58  ;;  %v829_v58 = vld [vmem:[%s1453_s8] sm:$0x1] }
 0x1f6   : > { %v795_v36 = vadd.f32 %v794_v33, %v787_v32 }
 0x1f7   : > { %v1228_v37 = vpop.eup %1227 }
 0x1f8   : > { %v796_v38 = vadd.f32 %v795_v36, %v788_v35  ;;  %v789_v39 = vmul.f32 %v1228_v37, %v733_v5  ;;  %v1230_v40 = vpop.eup %1229 }
 0x1f9   : > { %v791_v44 = vmul.f32 %v1230_v40, %v735_v2 }
 0x1fa   : > { %v797_v43 = vadd.f32 %v796_v38, %v789_v39 }
 0x1fc   : > { %v798_v45 = vadd.f32 %v797_v43, %v790_v41 }
 0x1fe   : > { %v799_v46 = vadd.f32 %v798_v45, %v791_v44 }
 0x200   : > { %v800_v47 = vrot.slane %v799_v46, 4 }
 0x202   : > { %v801_v48 = vadd.f32 %v800_v47, %v799_v46 }
 0x204   : > { %v802_v42 = vrot.slane %v801_v48, 2 }
 0x206   : > { %v803_v49 = vadd.f32 %v802_v42, %v801_v48 }
 0x208   : > { %v804_v51 = vrot.slane %v803_v49, 1 }
 0x20a   : > { %v805_v52 = vadd.f32 %v804_v51, %v803_v49 }
 0x20c   : > { %v806_v53 = vadd.f32 %v805_v52, %v792_v50 }
 0x20e   : > { %807 = vst [vmem:[#allocation2] sm:$0x1] %v806_v53 }
 0x215   : > { %v811_v54 = vld [vmem:[#allocation2] sm:$0x1] }
 0x216   : > { %v812_v55 = vmul.f32 0.015625, %v811_v54 }
 0x218   : > { %1125 = vmatmul.mubr.f32.vlgmr.msra.gmra.mxu0 %v812_v55 }
 0x2d8   : > { %v896_v60 = vpop.f32.mrf.mxu0 }
 0x2d9   : > { %v897_v61 = vadd.f32 %v896_v60, %v829_v58 }
 0x2da   : > { %v1126_v62 = vpop.f32.mrf.mxu0 }
 0x2db   : > { %v903_v63 = vrot.slane %v897_v61, %v902_v59 }
 0x2dd   : > { %904 = vst [vmem:[%s358_s14] sm:$0xff] %v903_v63 }
 0x2de PF: > { %s19_s11 = sadd.s32 1, %s1253_s11   ;;  %s1455_s30 = smov %s1249_s10 }
 0x2df   : > { %p16_p5 = scmp.ge.s32.totalorder %s19_s11, 4   ;;  %s1456_s10 = smov %s1458_s12 }
 0x2e1   :  { %18 = sbr.rel (!%p16_p5) target bundleno = 2 (0x2), region = 94 }

</bundles_post_ra>
